<compile_context>
chip_gen: v5e
topology: v5e:2x2
jax: 0.10.0
libtpu: 0.0.40
codegen_flags: <defaults>
</compile_context>

<pallas_src>
import functools
import math

import jax
import jax.numpy as jnp
from jax import lax
from jax.experimental import pallas as pl
from jax.experimental.pallas import tpu as pltpu


NEG_INF = -1e30  # finite "minus infinity" for masked vocab columns


def _round_up(x, m):
    return (x + m - 1) // m * m


def _tile_config(device_kind):
    """Per-TPU-generation (tile_m, tile_n, vmem_limit_bytes)."""
    k = (device_kind or "").lower()
    if "v5" in k:
        # v5e: most HBM-starved; 128 MiB VMEM but 16 MiB scoped default.
        return 256, 512, 96 * 1024 * 1024
    if "v6" in k:
        # v6e: 918 TF/s vs ~1.4 TB/s -> balance around tile_m ~ 512-1024.
        return 768, 512, 96 * 1024 * 1024
    if "v7" in k:
        # v7x: only 64 MiB VMEM / TC; 3.2 TB/s HBM -> balance near tile_m ~ 320.
        return 320, 512, 48 * 1024 * 1024
    return 256, 512, 48 * 1024 * 1024


def _masked_logits(x_ref, w_ref, b_ref, j, tile_n, vocab, needs_mask):
    """bf16-operand / f32-accumulate logits tile, with vocab-remainder masking."""
    logits = lax.dot_general(
        x_ref[...], w_ref[...],
        dimension_numbers=(((1,), (1,)), ((), ())),
        preferred_element_type=jnp.float32) + b_ref[...]
    if needs_mask:
        col = j * tile_n + lax.broadcasted_iota(jnp.int32, (1, tile_n), 1)
        logits = jnp.where(col < vocab, logits, NEG_INF)
    return logits


# ---------------- fused path: one kernel, one weight stream --------------------
def _fused_kernel(x_ref, w_ref, b_ref, o_ref, m_sc, l_sc,
                  *, tile_n, vocab, needs_mask):
    j = pl.program_id(1)

    @pl.when(j == 0)
    def _():
        m_sc[...] = jnp.full_like(m_sc, -jnp.inf)
        l_sc[...] = jnp.zeros_like(l_sc)

    logits = _masked_logits(x_ref, w_ref, b_ref, j, tile_n, vocab, needs_mask)

    # Online logsumexp update (all f32 VPU/EUP math).
    m_prev = m_sc[...]
    m_new = jnp.maximum(m_prev, jnp.max(logits, axis=-1, keepdims=True))
    l_sc[...] = (l_sc[...] * jnp.exp(m_prev - m_new)
                 + jnp.sum(jnp.exp(logits - m_new), axis=-1, keepdims=True))
    m_sc[...] = m_new

    # Stash raw logits into the resident output slab (lane-dense, 128-aligned).
    off = pl.multiple_of(j * tile_n, 128)
    o_ref[:, pl.ds(off, tile_n)] = logits.astype(o_ref.dtype)

    @pl.when(j == pl.num_programs(1) - 1)
    def _():
        lse = m_sc[...] + jnp.log(l_sc[...])
        o_ref[...] = (o_ref[...].astype(jnp.float32) - lse).astype(o_ref.dtype)


# ------------- two-pass path: pass 1 = logits + lse, pass 2 = subtract ---------
def _lse_logits_kernel(x_ref, w_ref, b_ref, logits_ref, lse_ref, m_sc, l_sc,
                       *, tile_n, vocab, needs_mask):
    j = pl.program_id(1)

    @pl.when(j == 0)
    def _():
        m_sc[...] = jnp.full_like(m_sc, -jnp.inf)
        l_sc[...] = jnp.zeros_like(l_sc)

    logits = _masked_logits(x_ref, w_ref, b_ref, j, tile_n, vocab, needs_mask)
    logits_ref[...] = logits.astype(logits_ref.dtype)

    m_prev = m_sc[...]
    m_new = jnp.maximum(m_prev, jnp.max(logits, axis=-1, keepdims=True))
    l_sc[...] = (l_sc[...] * jnp.exp(m_prev - m_new)
                 + jnp.sum(jnp.exp(logits - m_new), axis=-1, keepdims=True))
    m_sc[...] = m_new

    @pl.when(j == pl.num_programs(1) - 1)
    def _():
        lse_ref[...] = m_sc[...] + jnp.log(l_sc[...])


def _subtract_kernel(logits_ref, lse_ref, o_ref):
    o_ref[...] = (logits_ref[...].astype(jnp.float32)
                  - lse_ref[...]).astype(o_ref.dtype)


def final_layer(x, weight, bias, *, tile_m=None, tile_n=None,
                compute_dtype=jnp.bfloat16, out_dtype=jnp.float32,
                logits_dtype=jnp.bfloat16, vmem_limit_bytes=None,
                force_two_pass=False):
    """log_softmax(x @ weight.T + bias, axis=-1).

    x: (..., d_model); weight: (vocab, d_model); bias: (vocab,).
    For best performance pass/cache `weight` already in `compute_dtype` (bf16) so
    no host-side cast of the GiB-scale weight happens per call.
    """
    orig_shape = x.shape
    d_model = orig_shape[-1]
    vocab = weight.shape[0]

    try:
        kind = jax.devices()[0].device_kind
    except Exception:  # pragma: no cover
        kind = ""
    d_tm, d_tn, d_vmem = _tile_config(kind)
    tile_m = d_tm if tile_m is None else tile_m
    tile_n = d_tn if tile_n is None else tile_n
    vmem_limit_bytes = d_vmem if vmem_limit_bytes is None else vmem_limit_bytes

    x2d = x.reshape(-1, d_model)
    M = x2d.shape[0]

    # Clamp tiles to the (8/128-aligned) problem size.
    tile_m = max(8, min(tile_m, _round_up(M, 8)))
    tile_n = max(128, min(tile_n, _round_up(vocab, 128)))

    # v7x megacore: give both TensorCores row tiles when possible.
    if "v7" in (kind or "").lower() and pl.cdiv(M, tile_m) < 2 and M > 8:
        tile_m = max(8, _round_up(pl.cdiv(M, 2), 8))

    n_row = pl.cdiv(M, tile_m)
    n_col = pl.cdiv(vocab, tile_n)
    V_pad = n_col * tile_n
    needs_mask = V_pad != vocab
    grid = (n_row, n_col)

    # No host-side padding/transpose of the weight; only a dtype cast if needed.
    w_c = weight if weight.dtype == compute_dtype else weight.astype(compute_dtype)
    x_c = x2d if x2d.dtype == compute_dtype else x2d.astype(compute_dtype)
    b2d = bias.astype(jnp.float32).reshape(1, vocab)

    c_it = jnp.dtype(compute_dtype).itemsize
    o_it = jnp.dtype(out_dtype).itemsize
    l_it = jnp.dtype(logits_dtype).itemsize

    x_spec = pl.BlockSpec((tile_m, d_model), lambda i, j: (i, 0))
    w_spec = pl.BlockSpec((tile_n, d_model), lambda i, j: (j, 0))
    b_spec = pl.BlockSpec((1, tile_n), lambda i, j: (0, j))
    lse_spec = pl.BlockSpec((tile_m, 1), lambda i, j: (i, 0))

    matmul_flops = 2 * M * d_model * V_pad
    w_stream_bytes = n_row * vocab * d_model * c_it   # weight read once per row tile
    x_bytes = M * d_model * c_it
    b_bytes = n_row * vocab * 4
    out_bytes = M * V_pad * o_it

    # Fused path needs the (tile_m, V_pad) output slab (conservatively counted
    # double-buffered) plus double-buffered x/w/bias tiles to fit in VMEM.
    fused_bytes = (2 * tile_m * d_model * c_it
                   + 2 * tile_n * d_model * c_it
                   + 2 * tile_n * 4
                   + 2 * tile_m * V_pad * o_it
                   + 4 * tile_m * 4)
    use_fused = (not force_two_pass) and fused_bytes <= int(vmem_limit_bytes * 0.9)

    if use_fused:
        kernel = functools.partial(_fused_kernel, tile_n=tile_n, vocab=vocab,
                                   needs_mask=needs_mask)
        out = pl.pallas_call(
            kernel,
            out_shape=jax.ShapeDtypeStruct((M, V_pad), out_dtype),
            grid_spec=pltpu.PrefetchScalarGridSpec(
                num_scalar_prefetch=0,
                grid=grid,
                in_specs=[x_spec, w_spec, b_spec],
                out_specs=pl.BlockSpec((tile_m, V_pad), lambda i, j: (i, 0)),
                scratch_shapes=[pltpu.VMEM((tile_m, 1), jnp.float32),
                                pltpu.VMEM((tile_m, 1), jnp.float32)]),
            compiler_params=pltpu.CompilerParams(
                dimension_semantics=("parallel", "arbitrary"),
                vmem_limit_bytes=vmem_limit_bytes),
            cost_estimate=pl.CostEstimate(
                flops=matmul_flops,
                transcendentals=M * V_pad,
                bytes_accessed=w_stream_bytes + x_bytes + b_bytes + out_bytes),
        )(x_c, w_c, b2d)
    else:
        # Pass 1: logits (spilled to HBM in bf16) + online logsumexp.
        kernel1 = functools.partial(_lse_logits_kernel, tile_n=tile_n,
                                    vocab=vocab, needs_mask=needs_mask)
        logits, lse = pl.pallas_call(
            kernel1,
            out_shape=(jax.ShapeDtypeStruct((M, V_pad), logits_dtype),
                       jax.ShapeDtypeStruct((M, 1), jnp.float32)),
            grid_spec=pltpu.PrefetchScalarGridSpec(
                num_scalar_prefetch=0,
                grid=grid,
                in_specs=[x_spec, w_spec, b_spec],
                out_specs=(pl.BlockSpec((tile_m, tile_n), lambda i, j: (i, j)),
                           lse_spec),
                scratch_shapes=[pltpu.VMEM((tile_m, 1), jnp.float32),
                                pltpu.VMEM((tile_m, 1), jnp.float32)]),
            compiler_params=pltpu.CompilerParams(
                dimension_semantics=("parallel", "arbitrary"),
                vmem_limit_bytes=vmem_limit_bytes),
            cost_estimate=pl.CostEstimate(
                flops=matmul_flops,
                transcendentals=M * V_pad,
                bytes_accessed=(w_stream_bytes + x_bytes + b_bytes
                                + M * V_pad * l_it + M * 4)),
        )(x_c, w_c, b2d)

        # Pass 2: element-wise (logits - lse); no matmul, no weight stream.
        out = pl.pallas_call(
            _subtract_kernel,
            out_shape=jax.ShapeDtypeStruct((M, V_pad), out_dtype),
            grid_spec=pltpu.PrefetchScalarGridSpec(
                num_scalar_prefetch=0,
                grid=grid,
                in_specs=[pl.BlockSpec((tile_m, tile_n), lambda i, j: (i, j)),
                          lse_spec],
                out_specs=pl.BlockSpec((tile_m, tile_n), lambda i, j: (i, j))),
            compiler_params=pltpu.CompilerParams(
                dimension_semantics=("parallel", "parallel"),
                vmem_limit_bytes=vmem_limit_bytes),
            cost_estimate=pl.CostEstimate(
                flops=M * V_pad,
                transcendentals=0,
                bytes_accessed=M * V_pad * l_it + M * 4 + out_bytes),
        )(logits, lse)

    if needs_mask:
        out = out[:, :vocab]
    return out.reshape(*orig_shape[:-1], vocab)


if __name__ == "__main__":
    # Small, module-consistent shapes: batch=2, seq=8, d_model=32, vocab=128.
    B, S, d_model, vocab = 2, 8, 32, 128

    key = jax.random.PRNGKey(0)
    kx, kw, kb = jax.random.split(key, 3)

    # Deterministic parameter init (nn.Linear-style uniform bounds).
    bound = 1.0 / math.sqrt(d_model)
    weight = jax.random.uniform(kw, (vocab, d_model), jnp.float32, -bound, bound)
    bias = jax.random.uniform(kb, (vocab,), jnp.float32, -bound, bound)
    x = jax.random.normal(kx, (B, S, d_model), jnp.float32)

    def ref_logprobs_bf16(x_, w_, b_):
        # Same bf16-operand / f32-accumulate matmul as the kernel, f32 softmax.
        logits = lax.dot_general(
            x_.reshape(-1, x_.shape[-1]).astype(jnp.bfloat16),
            w_.astype(jnp.bfloat16),
            dimension_numbers=(((1,), (1,)), ((), ())),
            preferred_element_type=jnp.float32) + b_
        lp = jax.nn.log_softmax(logits, axis=-1)
        return lp.reshape(*x_.shape[:-1], w_.shape[0])

    # ---- 1) fused path, aligned shapes ----
    out = jax.block_until_ready(final_layer(x, weight, bias))
    assert out.shape == (B, S, vocab)
    ref_bf16 = ref_logprobs_bf16(x, weight, bias)
    assert jnp.allclose(out, ref_bf16, atol=1e-3, rtol=1e-3), (
        float(jnp.max(jnp.abs(out - ref_bf16))))
    ref_f32 = jax.nn.log_softmax(x @ weight.T + bias, axis=-1)
    assert jnp.allclose(out, ref_f32, atol=5e-2, rtol=5e-2), (
        float(jnp.max(jnp.abs(out - ref_f32))))

    # ---- 2) two-pass (logits spill) path, same inputs ----
    # Looser tol: pass-1 stores logits in bf16 before pass-2 subtracts the lse.
    out2 = jax.block_until_ready(final_layer(x, weight, bias, force_two_pass=True))
    assert out2.shape == (B, S, vocab)
    assert jnp.allclose(out2, ref_bf16, atol=2e-2, rtol=2e-2), (
        float(jnp.max(jnp.abs(out2 - ref_bf16))))

    # ---- 3) fused path, unaligned shapes (in-kernel vocab mask + partial rows) ----
    B2, S2, d2, V2 = 1, 14, 32, 200
    kx2, kw2, kb2 = jax.random.split(jax.random.PRNGKey(1), 3)
    bound2 = 1.0 / math.sqrt(d2)
    w2 = jax.random.uniform(kw2, (V2, d2), jnp.float32, -bound2, bound2)
    b2 = jax.random.uniform(kb2, (V2,), jnp.float32, -bound2, bound2)
    x2 = jax.random.normal(kx2, (B2, S2, d2), jnp.float32)
    out3 = jax.block_until_ready(final_layer(x2, w2, b2))
    assert out3.shape == (B2, S2, V2)
    ref3 = ref_logprobs_bf16(x2, w2, b2)
    assert jnp.allclose(out3, ref3, atol=1e-3, rtol=1e-3), (
        float(jnp.max(jnp.abs(out3 - ref3))))

    print("KERNEL_OK")
</pallas_src>

<mosaic_0001>
module attributes {stable_mosaic.version = 11 : i64} {
  func.func @_fused_kernel(%arg0: i32, %arg1: i32, %arg2: memref<16x32xbf16, #tpu.memory_space<vmem>>, %arg3: memref<128x32xbf16, #tpu.memory_space<vmem>>, %arg4: memref<1x128xf32, #tpu.memory_space<vmem>>, %arg5: memref<16x128xf32, #tpu.memory_space<vmem>>, %arg6: memref<16x1xf32, #tpu.memory_space<vmem>>, %arg7: memref<16x1xf32, #tpu.memory_space<vmem>>) attributes {dimension_semantics = [#tpu.dimension_semantics<parallel>, #tpu.dimension_semantics<arbitrary>], iteration_bounds = array<i64: 1, 1>, scalar_prefetch = 0 : i64, scratch_operands = 2 : i64, tpu.core_type = #tpu.core_type<tc>, window_params = [{transform_indices = @transform_0, window_bounds = array<i64: 16, 32>}, {transform_indices = @transform_1, window_bounds = array<i64: 128, 32>}, {transform_indices = @transform_2, window_bounds = array<i64: 1, 128>}, {transform_indices = @transform_3, window_bounds = array<i64: 16, 128>}]} {
    %c0_i32 = arith.constant 0 : i32
    %0 = arith.cmpi eq, %arg1, %c0_i32 : i32
    %1 = arith.extui %0 : i1 to i32
    %c0_i32_0 = arith.constant 0 : i32
    %2 = arith.cmpi ne, %1, %c0_i32_0 : i32
    scf.if %2 {
      %cst_19 = arith.constant 0xFF800000 : f32
      %32 = vector.broadcast %cst_19 : f32 to vector<16x1xf32>
      %c0_20 = arith.constant 0 : index
      %c0_21 = arith.constant 0 : index
      %33 = vector.load %arg6[%c0_20, %c0_21] : memref<16x1xf32, #tpu.memory_space<vmem>>, vector<16x1xf32>
      tpu.vector_store %arg6[%c0_20, %c0_21], %32 {strides = array<i32>} : memref<16x1xf32, #tpu.memory_space<vmem>>, vector<16x1xf32>,
      %cst_22 = arith.constant 0.000000e+00 : f32
      %34 = vector.broadcast %cst_22 : f32 to vector<16x1xf32>
      %c0_23 = arith.constant 0 : index
      %c0_24 = arith.constant 0 : index
      %35 = vector.load %arg7[%c0_23, %c0_24] : memref<16x1xf32, #tpu.memory_space<vmem>>, vector<16x1xf32>
      tpu.vector_store %arg7[%c0_23, %c0_24], %34 {strides = array<i32>} : memref<16x1xf32, #tpu.memory_space<vmem>>, vector<16x1xf32>,
    } else {
    }
    %c0 = arith.constant 0 : index
    %c0_1 = arith.constant 0 : index
    %3 = vector.load %arg2[%c0, %c0_1] : memref<16x32xbf16, #tpu.memory_space<vmem>>, vector<16x32xbf16>
    %c0_2 = arith.constant 0 : index
    %c0_3 = arith.constant 0 : index
    %4 = vector.load %arg3[%c0_2, %c0_3] : memref<128x32xbf16, #tpu.memory_space<vmem>>, vector<128x32xbf16>
    %cst = arith.constant dense<0.000000e+00> : vector<16x128xf32>
    %5 = tpu.matmul %3, %4, %cst {dimension_numbers = #tpu.dot_dimension_numbers<[1], [1], [0], [0], [0, 0, 1, 0], [], []>} : vector<16x32xbf16>, vector<128x32xbf16>, vector<16x128xf32> -> vector<16x128xf32>
    %c0_4 = arith.constant 0 : index
    %c0_5 = arith.constant 0 : index
    %6 = vector.load %arg4[%c0_4, %c0_5] : memref<1x128xf32, #tpu.memory_space<vmem>>, vector<1x128xf32>
    %7 = vector.broadcast %6 : vector<1x128xf32> to vector<16x128xf32>
    %8 = arith.addf %5, %7 : vector<16x128xf32>
    %c0_6 = arith.constant 0 : index
    %c0_7 = arith.constant 0 : index
    %9 = vector.load %arg6[%c0_6, %c0_7] : memref<16x1xf32, #tpu.memory_space<vmem>>, vector<16x1xf32>
    %cst_8 = arith.constant dense<0xFF800000> : vector<16xf32>
    %10 = vector.multi_reduction <maximumf>, %8, %cst_8 [1] : vector<16x128xf32> to vector<16xf32>
    %11 = vector.shape_cast %10 : vector<16xf32> to vector<16x1xf32>
    %12 = arith.maximumf %9, %11 : vector<16x1xf32>
    %c0_9 = arith.constant 0 : index
    %c0_10 = arith.constant 0 : index
    %13 = vector.load %arg7[%c0_9, %c0_10] : memref<16x1xf32, #tpu.memory_space<vmem>>, vector<16x1xf32>
    %14 = arith.subf %9, %12 : vector<16x1xf32>
    %15 = math.exp %14 : vector<16x1xf32>
    %16 = arith.mulf %13, %15 : vector<16x1xf32>
    %17 = vector.broadcast %12 : vector<16x1xf32> to vector<16x128xf32>
    %18 = arith.subf %8, %17 : vector<16x128xf32>
    %19 = math.exp %18 : vector<16x128xf32>
    %cst_11 = arith.constant dense<0.000000e+00> : vector<16xf32>
    %20 = vector.multi_reduction <add>, %19, %cst_11 [1] : vector<16x128xf32> to vector<16xf32>
    %21 = vector.shape_cast %20 : vector<16xf32> to vector<16x1xf32>
    %22 = arith.addf %16, %21 : vector<16x1xf32>
    %c0_12 = arith.constant 0 : index
    %c0_13 = arith.constant 0 : index
    %23 = vector.load %arg7[%c0_12, %c0_13] : memref<16x1xf32, #tpu.memory_space<vmem>>, vector<16x1xf32>
    tpu.vector_store %arg7[%c0_12, %c0_13], %22 {strides = array<i32>} : memref<16x1xf32, #tpu.memory_space<vmem>>, vector<16x1xf32>,
    %c0_14 = arith.constant 0 : index
    %c0_15 = arith.constant 0 : index
    %24 = vector.load %arg6[%c0_14, %c0_15] : memref<16x1xf32, #tpu.memory_space<vmem>>, vector<16x1xf32>
    tpu.vector_store %arg6[%c0_14, %c0_15], %12 {strides = array<i32>} : memref<16x1xf32, #tpu.memory_space<vmem>>, vector<16x1xf32>,
    %c128_i32 = arith.constant 128 : i32
    %25 = arith.muli %arg1, %c128_i32 : i32
    %26 = tpu.assume_multiple %25, 128 : i32
    %c0_16 = arith.constant 0 : index
    %27 = arith.index_cast %26 : i32 to index
    %28 = vector.load %arg5[%c0_16, %27] : memref<16x128xf32, #tpu.memory_space<vmem>>, vector<16x128xf32>
    tpu.vector_store %arg5[%c0_16, %27], %8 {strides = array<i32>} : memref<16x128xf32, #tpu.memory_space<vmem>>, vector<16x128xf32>,
    %c0_i32_17 = arith.constant 0 : i32
    %29 = arith.cmpi eq, %arg1, %c0_i32_17 : i32
    %30 = arith.extui %29 : i1 to i32
    %c0_i32_18 = arith.constant 0 : i32
    %31 = arith.cmpi ne, %30, %c0_i32_18 : i32
    scf.if %31 {
      %c0_19 = arith.constant 0 : index
      %c0_20 = arith.constant 0 : index
      %32 = vector.load %arg6[%c0_19, %c0_20] : memref<16x1xf32, #tpu.memory_space<vmem>>, vector<16x1xf32>
      %c0_21 = arith.constant 0 : index
      %c0_22 = arith.constant 0 : index
      %33 = vector.load %arg7[%c0_21, %c0_22] : memref<16x1xf32, #tpu.memory_space<vmem>>, vector<16x1xf32>
      %34 = math.log %33 : vector<16x1xf32>
      %35 = arith.addf %32, %34 : vector<16x1xf32>
      %c0_23 = arith.constant 0 : index
      %c0_24 = arith.constant 0 : index
      %36 = vector.load %arg5[%c0_23, %c0_24] : memref<16x128xf32, #tpu.memory_space<vmem>>, vector<16x128xf32>
      %37 = vector.broadcast %35 : vector<16x1xf32> to vector<16x128xf32>
      %38 = arith.subf %36, %37 : vector<16x128xf32>
      %c0_25 = arith.constant 0 : index
      %c0_26 = arith.constant 0 : index
      %39 = vector.load %arg5[%c0_25, %c0_26] : memref<16x128xf32, #tpu.memory_space<vmem>>, vector<16x128xf32>
      tpu.vector_store %arg5[%c0_25, %c0_26], %38 {strides = array<i32>} : memref<16x128xf32, #tpu.memory_space<vmem>>, vector<16x128xf32>,
    } else {
    }
    return
  }
  func.func @transform_0(%arg0: i32, %arg1: i32) -> (i32, i32) {
    %c0_i32 = arith.constant 0 : i32
    %c0_i32_0 = arith.constant 0 : i32
    return %arg0, %c0_i32 : i32, i32
  }
  func.func @transform_1(%arg0: i32, %arg1: i32) -> (i32, i32) {
    %c0_i32 = arith.constant 0 : i32
    %c0_i32_0 = arith.constant 0 : i32
    return %arg1, %c0_i32 : i32, i32
  }
  func.func @transform_2(%arg0: i32, %arg1: i32) -> (i32, i32) {
    %c0_i32 = arith.constant 0 : i32
    %c0_i32_0 = arith.constant 0 : i32
    return %c0_i32, %arg1 : i32, i32
  }
  func.func @transform_3(%arg0: i32, %arg1: i32) -> (i32, i32) {
    %c0_i32 = arith.constant 0 : i32
    %c0_i32_0 = arith.constant 0 : i32
    return %arg0, %c0_i32 : i32, i32
  }
}

</mosaic_0001>

<bundles_post_ra>
// kernel: tpu_custom_call.1
= control target key start
LH: loop header
LB: loop body
LE: loop exit
PB: predicated region body
PF: predicated region fallthrough
CT: control target
= control target key end

     0   :  { %vm91_vm0 = vcmask 261120   ;;  %s411_s0 = inlined_call_operand.vmem [shape: bf16[16,32], index: 0, kind: input, shape index: {}]   ;;  %s412_s1 = inlined_call_operand.vmem [shape: bf16[128,32], index: 1, kind: input, shape index: {}]   ;;  %s413_s2 = inlined_call_operand.vmem [shape: f32[1,128], index: 2, kind: input, shape index: {}]   ;;  %s414_s3 = inlined_call_operand.hbm [shape: f32[16,128], index: 3, kind: output, shape index: {}]  }
   0x1   :  { %v277_v0 = vld [vmem:[%s412_s1 + $0x38] sm:$0xff] }
   0x2   :  { %v117_v1 = vsel %vm91_vm0, %v277_v0, 0 }
   0x3   :  { %8 = vsyncpa [#allocation5], 0  ;;  %119 = vmatpush.bf16.xpose.msra.mxu0 %v117_v1  ;;  %v276_v2 = vld [vmem:[%s412_s1 + $0x30] sm:$0xff]  ;;  %v275_v4 = vld [vmem:[%s412_s1 + $0x28] sm:$0xff]  ;;  %vm19_vm1 = vcmask 7168   ;;  %v325_v22 = vmov -inf  }
   0x4   :  { %v114_v3 = vsel %vm91_vm0, %v276_v2, 0  ;;  %v111_v5 = vsel %vm91_vm0, %v275_v4, 0  ;;  %v274_v6 = vld [vmem:[%s412_s1 + $0x20] sm:$0xff]  ;;  %v273_v8 = vld [vmem:[%s412_s1 + $0x18] sm:$0xff]  ;;  %v272_v10 = vld [vmem:[%s412_s1 + $0x10] sm:$0xff]  ;;  %20 = vst.msk [vmem:[#allocation2] sm:$0xff] %vm19_vm1, %v325_v22 }
   0x5   :  { %v108_v7 = vsel %vm91_vm0, %v274_v6, 0  ;;  %v105_v9 = vsel %vm91_vm0, %v273_v8, 0  ;;  %v102_v11 = vsel %vm91_vm0, %v272_v10, 0  ;;  %v271_v12 = vld [vmem:[%s412_s1 + $0x8] sm:$0xff]  ;;  %v270_v14 = vld [vmem:[%s412_s1] sm:$0xff]  ;;  %21 = vst.msk [vmem:[#allocation2 + $0x8] sm:$0xff] %vm19_vm1, %v325_v22 }
   0x6   :  { %v99_v13 = vsel %vm91_vm0, %v271_v12, 0  ;;  %v96_v15 = vsel %vm91_vm0, %v270_v14, 0  ;;  %v269_v16 = vld [vmem:[%s411_s0] sm:$0xff]  ;;  %v326_v23 = vmov 0   ;;  %v327_v24 = vmov 0.0   ;;  %s328_s0 = smov [#allocation4]  }
   0x7   :  { %v286_v17 = vld [vmem:[%s413_s2] ss:$0 sm:$0xff]  ;;  %284 = vset.pattern.permute.xlu1 %v326_v23  ;;  %285 = vset.pattern.permute.xlu0 %v326_v23  ;;  %22 = vst.msk [vmem:[#allocation3] sm:$0xff] %vm19_vm1, %v327_v24  ;;  %s217_s1 = sshll.u32 %s328_s0, 4  ;;  %s219_s6 = sshll.u32 %s414_s3, 4  ;;  %s218_s1 = int_to_ptr.vmem [resolvable:$true] %s217_s1  ;;  %s220_s6 = int_to_ptr.hbm [resolvable:$true] %s219_s6 }
   0x8   :  { %23 = vst.msk [vmem:[#allocation3 + $0x8] sm:$0xff] %vm19_vm1, %v327_v24  ;;  %s329_s7 = smov 128   ;;  %s330_s8 = smov 8  }
   0xb   :  { %120 = vmatpush.bf16.xpose.msra.mxu0 %v114_v3  ;;  %v133_v25 = vld [vmem:[#allocation2] sm:$0xff] }
   0xc   :  { %v134_v29 = vld [vmem:[#allocation2 + $0x8] sm:$0xff] }
   0xe   :  { %v141_v44 = vld [vmem:[#allocation3] sm:$0xff] }
   0xf   :  { %v142_v49 = vld [vmem:[#allocation3 + $0x8] sm:$0xff] }
  0x13   :  { %121 = vmatpush.bf16.xpose.msra.mxu0 %v111_v5 }
  0x1b   :  { %122 = vmatpush.bf16.xpose.msra.mxu0 %v108_v7 }
  0x23   :  { %123 = vmatpush.bf16.xpose.msra.mxu0 %v105_v9 }
  0x2b   :  { %124 = vmatpush.bf16.xpose.msra.mxu0 %v102_v11 }
  0x33   :  { %125 = vmatpush.bf16.xpose.msra.mxu0 %v99_v13 }
  0x3b   :  { %126 = vmatpush.bf16.xpose.msra.mxu0 %v96_v15 }
  0x42   :  { %268 = vmatmul.msk.bf16.vlgmr.msra.gmra.mxu0 %vm91_vm0, %v269_v16 }
  0xbf   :  { %v128_v18 = vpop.f32.mrf.mxu0 }
  0xc0   :  { %v390_v19 = vadd.f32 %v286_v17, %v128_v18 }
  0xc2   :  { %135 = vmax.xlane.f32.xlu0 %v390_v19 }
  0xc7   :  { %v130_v20 = vpop.f32.mrf.mxu0 }
  0xc8   :  { %v393_v21 = vadd.f32 %v286_v17, %v130_v20 }
  0xca   :  { %137 = vmax.xlane.f32.xlu0 %v393_v21 }
 0x135   :  { %v136_v26 = vpop.xlane.xlu0 %135 }
 0x136   :  { %v139_v27 = vmax.f32 %v133_v25, %v136_v26 }
 0x138   :  { %v143_v28 = vsub.f32 %v133_v25, %v139_v27  ;;  %176 = vst.msk [vmem:[#allocation2] sm:$0xff] %vm19_vm1, %v139_v27  ;;  %153 = vperm.xlu1 %284, %v139_v27  }
 0x13a   :  { %v145_v41 = vmul.f32 1.442695, %v143_v28 }
 0x13d   :  { %v138_v30 = vpop.xlane.xlu0 %137 }
 0x13e   :  { %v140_v31 = vmax.f32 %v134_v29, %v138_v30 }
 0x13f   :  { %v187_v57 = vld [vmem:[#allocation2] sm:$0xff] }
 0x140   :  { %v144_v32 = vsub.f32 %v134_v29, %v140_v31  ;;  %177 = vst.msk [vmem:[#allocation2 + $0x8] sm:$0xff] %vm19_vm1, %v140_v31  ;;  %158 = vperm.xlu1 %284, %v140_v31  }
 0x142   :  { %v147_v42 = vmul.f32 1.442695, %v144_v32 }
 0x147   :  { %v188_v61 = vld [vmem:[#allocation2 + $0x8] sm:$0xff] }
 0x1aa   :  { %v154_v33 = vpop.permute.xlu1 %153 }
 0x1ab   :  { %v161_v34 = vsub.f32 %v390_v19, %v154_v33 }
 0x1ad   :  { %v163_v35 = vmul.f32 1.442695, %v161_v34 }
 0x1af   :  { %287 = vpow2.f32 %v163_v35 }
 0x1b2   :  { %v159_v36 = vpop.permute.xlu1 %158 }
 0x1b3   :  { %v162_v37 = vsub.f32 %v393_v21, %v159_v36 }
 0x1b5   :  { %v288_v38 = vpop.eup %287  ;;  %v165_v39 = vmul.f32 1.442695, %v162_v37 }
 0x1b6   :  { %167 = vadd.xlane.f32.xlu2 %v288_v38 }
 0x1b7   :  { %289 = vpow2.f32 %v165_v39 }
 0x1b8   :  { %291 = vpow2.f32 %v145_v41 }
 0x1b9   :  { %293 = vpow2.f32 %v147_v42 }
 0x1bd   :  { %v290_v40 = vpop.eup %289 }
 0x1be   :  { %169 = vadd.xlane.f32.xlu2 %v290_v40  ;;  %v292_v43 = vpop.eup %291 }
 0x1bf   :  { %v149_v45 = vmul.f32 %v292_v43, %v141_v44  ;;  %v294_v48 = vpop.eup %293 }
 0x1c0   :  { %v150_v50 = vmul.f32 %v294_v48, %v142_v49 }
 0x229   :  { %v168_v46 = vpop.xlane.xlu2 %167 }
 0x22a   :  { %v171_v47 = vadd.f32 %v168_v46, %v149_v45 }
 0x22c   :  { %174 = vst.msk [vmem:[#allocation3] sm:$0xff] %vm19_vm1, %v171_v47 }
 0x231   :  { %v170_v51 = vpop.xlane.xlu2 %169 }
 0x232   :  { %v172_v52 = vadd.f32 %v170_v51, %v150_v50 }
 0x233   :  { %v189_v53 = vld [vmem:[#allocation3] sm:$0xff] }
 0x234   :  { %175 = vst.msk [vmem:[#allocation3 + $0x8] sm:$0xff] %vm19_vm1, %v172_v52  ;;  %295 = vlog2.f32 %v189_v53 }
 0x23a   :  { %v296_v54 = vpop.eup %295 }
 0x23b   :  { %v192_v55 = vmul.f32 0.6931472, %v296_v54  ;;  %v190_v56 = vld [vmem:[#allocation3 + $0x8] sm:$0xff] }
 0x23c   :  { %297 = vlog2.f32 %v190_v56 }
 0x23d   :  { %v195_v58 = vadd.f32 %v192_v55, %v187_v57 }
 0x23f   :  { %201 = vperm.xlu0 %285, %v195_v58  }
 0x242   :  { %v298_v59 = vpop.eup %297 }
 0x243   :  { %v194_v60 = vmul.f32 0.6931472, %v298_v59 }
 0x245   :  { %v196_v62 = vadd.f32 %v194_v60, %v188_v61 }
 0x247   :  { %206 = vperm.xlu1 %284, %v196_v62  }
 0x2b1   :  { %v202_v63 = vpop.permute.xlu0 %201 }
 0x2b2   :  { %v209_v0 = vsub.f32 %v390_v19, %v202_v63 }
 0x2b4   :  { %211 = vst [vmem:[#allocation4] sm:$0xff] %v209_v0 }
 0x2b9   :  { %v207_v1 = vpop.permute.xlu1 %206 }
 0x2ba   :  { %v210_v2 = vsub.f32 %v393_v21, %v207_v1 }
 0x2bc   :  { %212 = vst [vmem:[#allocation4 + $0x8] sm:$0xff] %v210_v2 }
 0x2bd   :  { %225 = dma.vmem_to_hbm [thread:$0]  %s218_s1, 256, %s220_s6, [#allocation5], %s329_s7, %s329_s7, %s330_s8  }
 0x2be   :  { %323 = dma.done.wait [#allocation5], 256  }
 0x2bf   :  { %324 = vsyncadd [#allocation5], 4294967040 }
 0x2c0   :  { %230 = vsyncpa [#allocation5], 1 }

</bundles_post_ra>
